<compile_context>
chip_gen: v6e
topology: v6e:2x2x1
jax: 0.10.0
libtpu: 0.0.40
codegen_flags: <defaults>
</compile_context>

<pallas_src>
import functools

import jax
import jax.numpy as jnp
from jax.experimental import pallas as pl
from jax.experimental.pallas import tpu as pltpu


# TODO(synk): backbone_module is an arbitrary user-supplied nn.Module; it is
# treated as identity here (only the classifier head is implemented).


def _round_up(x, m):
    return (x + m - 1) // m * m


def _classifier_kernel(x_ref, w_ref, b_ref, o_ref, acc_ref, *, hw, ragged):
    """One (batch-tile, spatial-chunk) grid step.

    x_ref  : [tb, C, ts]    activations in native [B, C, H*W] layout
    w_ref  : [C, N_pad]     weight.T / (H*W)  (grid-invariant, single-buffered)
    b_ref  : [1, N_pad]     bias              (grid-invariant, single-buffered)
    o_ref  : [1, tb, N_pad] sigmoid(logits) output block
    acc_ref: [tb, C] f32    running spatial sum (VMEM scratch)
    """
    sp = pl.program_id(1)

    @pl.when(sp == 0)
    def _():
        acc_ref[...] = jnp.zeros_like(acc_ref)

    x = x_ref[...].astype(jnp.float32)                  # [tb, C, ts]
    if ragged:
        # Last spatial chunk extends past H*W: zero the out-of-bounds lanes.
        # Cheap VPU select; the kernel is HBM-bound so this is free.
        ts = x.shape[-1]
        lane = jax.lax.broadcasted_iota(jnp.int32, x.shape, 2)
        x = jnp.where(sp * ts + lane < hw, x, 0.0)
    acc_ref[...] += jnp.sum(x, axis=-1)                 # spatial partial sum

    @pl.when(sp == pl.num_programs(1) - 1)
    def _():
        # mean-pool @ W.T + b == sum-pool @ (W.T / HW) + b  (scale folded in).
        logits = jnp.dot(acc_ref[...], w_ref[...],
                         preferred_element_type=jnp.float32,
                         precision=jax.lax.Precision.HIGHEST) + b_ref[...]
        o_ref[0] = jax.nn.sigmoid(logits).astype(o_ref.dtype)


def _resident_spec(shape):
    """BlockSpec for a grid-invariant operand (constant index_map).

    Single-buffer it when the API supports pipeline_mode: double-buffering a
    block that never changes only wastes VMEM (matters for large C / many
    classes under v7x's 64 MiB ceiling)."""
    index_map = lambda b, s: (0,) * len(shape)
    try:
        return pl.BlockSpec(shape, index_map, pipeline_mode=pl.Buffered(1))
    except (TypeError, ValueError, AttributeError):
        return pl.BlockSpec(shape, index_map)


def _choose_tiles(B, C, HW, itemsize, n_pad, vmem_budget, spatial_tile_cap):
    """Pick (batch_tile, spatial_tile).

    batch tile  : a divisor of B (leading dim -> no sublane constraint).
                  Prefer the largest divisor that still leaves >= 2 batch
                  tiles so the "parallel" axis feeds both v7x TensorCores.
    spatial tile: lane axis.  Either the full HW (no ragged tail) or a
                  multiple of 128 <= HW, grown until the double-buffered x
                  block fills the VMEM budget (big DMAs -> HBM roofline).
    """
    def vmem_use(tb, ts):
        return (2 * tb * C * ts * itemsize   # x block, double-buffered
                + C * n_pad * 4              # weight (single-buffered)
                + n_pad * 4                  # bias   (single-buffered)
                + tb * C * 4                 # f32 accumulator scratch
                + 2 * tb * n_pad * 4)        # output block, double-buffered

    min_ts = HW if HW <= 128 else 128
    divisors = [d for d in range(1, B + 1) if B % d == 0]
    parallel = [d for d in reversed(divisors) if B // d >= 2]
    candidates = parallel if parallel else [B]          # B == 1 -> single tile
    tb = next((d for d in candidates if vmem_use(d, min_ts) <= vmem_budget), 1)

    cap = HW if spatial_tile_cap is None else min(HW, spatial_tile_cap)
    if cap >= HW and vmem_use(tb, HW) <= vmem_budget:
        ts = HW                              # full spatial extent, no ragged tail
    else:
        ts = min_ts
        while ts + 128 <= cap and vmem_use(tb, ts + 128) <= vmem_budget:
            ts += 128
    return tb, ts


def classifier_forward(x_nchw, weight, bias, *, spatial_tile_cap=None):
    """x_nchw: [B, C, H, W] (f32 or bf16); weight: [N, C]; bias: [N] -> [B, N]."""
    B, C, H, W = x_nchw.shape
    N = weight.shape[0]
    HW = H * W

    # Consume the backbone output in its native [B, C, H*W] layout
    # (pure reshape: no transpose, no pad, no extra HBM traffic).
    x = x_nchw.reshape(B, C, HW)

    N_pad = max(128, _round_up(N, 128))

    # Per-generation VMEM budget (64 MiB on v7x, 128 MiB on v5e/v6e) with
    # ~20% headroom for Mosaic internals; no extra safety doubling.
    try:
        vmem_cap = pltpu.get_tpu_info().vmem_capacity_bytes
    except Exception:
        vmem_cap = 64 * 1024 * 1024          # conservative fallback (v7x)
    vmem_budget = int(0.8 * vmem_cap)

    tb, ts = _choose_tiles(B, C, HW, jnp.dtype(x.dtype).itemsize, N_pad,
                           vmem_budget, spatial_tile_cap)
    nb = B // tb                              # tb divides B exactly
    ns = pl.cdiv(HW, ts)
    ragged = (HW % ts) != 0

    # Fold the 1/(H*W) mean scale into the weight; pad classes to 128 lanes.
    w_p = jnp.pad(weight.T.astype(jnp.float32) / float(HW),
                  ((0, 0), (0, N_pad - N)))
    b_p = jnp.pad(bias.astype(jnp.float32), (0, N_pad - N)).reshape(1, N_pad)

    kernel = functools.partial(_classifier_kernel, hw=HW, ragged=ragged)

    out3 = pl.pallas_call(
        kernel,
        out_shape=jax.ShapeDtypeStruct((nb, tb, N_pad), jnp.float32),
        grid_spec=pltpu.PrefetchScalarGridSpec(
            num_scalar_prefetch=0,
            grid=(nb, ns),
            in_specs=[
                pl.BlockSpec((tb, C, ts), lambda b, s: (b, 0, s)),
                _resident_spec((C, N_pad)),
                _resident_spec((1, N_pad)),
            ],
            out_specs=pl.BlockSpec((1, tb, N_pad), lambda b, s: (b, 0, 0)),
            scratch_shapes=[pltpu.VMEM((tb, C), jnp.float32)],
        ),
        compiler_params=pltpu.CompilerParams(
            dimension_semantics=("parallel", "arbitrary"),
            vmem_limit_bytes=vmem_budget,
        ),
    )(x, w_p, b_p)

    # (nb, tb, N_pad) -> (B, N): nb * tb == B, so only the tiny class slice.
    return out3.reshape(B, N_pad)[:, :N]


if __name__ == "__main__":
    key = jax.random.PRNGKey(0)
    k_x, k_w, k_x2 = jax.random.split(key, 3)

    def reference(x, weight, bias):
        Br, Cr = x.shape[:2]
        pooled = jnp.mean(x.reshape(Br, Cr, -1), axis=-1)
        logits = jnp.dot(pooled, weight.T,
                         precision=jax.lax.Precision.HIGHEST) + bias[None, :]
        return jax.nn.sigmoid(logits)

    # --- Test 1: spec-sized input (B=2, C=4, 16x16), auto-sized tiles. ---
    B, C, H, W = 2, 4, 16, 16
    num_classes = 8
    x = jax.random.normal(k_x, (B, C, H, W), dtype=jnp.float32)
    # _initialize_weights: Linear weight ~ N(0, 0.01), bias zero.
    weight = 0.01 * jax.random.normal(k_w, (num_classes, C), dtype=jnp.float32)
    bias = jnp.zeros((num_classes,), dtype=jnp.float32)

    out = jax.block_until_ready(classifier_forward(x, weight, bias))
    assert out.shape == (B, num_classes)
    assert jnp.allclose(out, reference(x, weight, bias), atol=1e-5), "mismatch"

    # --- Test 2: ragged spatial extent (15x15 = 225) with a 128-lane chunk
    # cap -> exercises multi-chunk accumulation + the in-kernel tail mask. ---
    x2 = jax.random.normal(k_x2, (B, C, 15, 15), dtype=jnp.float32)
    out2 = jax.block_until_ready(
        classifier_forward(x2, weight, bias, spatial_tile_cap=128))
    assert out2.shape == (B, num_classes)
    assert jnp.allclose(out2, reference(x2, weight, bias), atol=1e-5), "mismatch"

    print("KERNEL_OK")
</pallas_src>

<mosaic_0001>
module attributes {stable_mosaic.version = 11 : i64} {
  func.func @_classifier_kernel(%arg0: i32, %arg1: i32, %arg2: memref<1x4x256xf32, #tpu.memory_space<vmem>>, %arg3: memref<4x128xf32, #tpu.memory_space<vmem>>, %arg4: memref<1x128xf32, #tpu.memory_space<vmem>>, %arg5: memref<1x1x128xf32, #tpu.memory_space<vmem>>, %arg6: memref<1x4xf32, #tpu.memory_space<vmem>>) attributes {dimension_semantics = [#tpu.dimension_semantics<parallel>, #tpu.dimension_semantics<arbitrary>], iteration_bounds = array<i64: 2, 1>, scalar_prefetch = 0 : i64, scratch_operands = 1 : i64, tpu.core_type = #tpu.core_type<tc>, window_params = [{transform_indices = @transform_0, window_bounds = array<i64: 1, 4, 256>}, {pipeline_mode = #tpu.pipeline_mode<synchronous>, transform_indices = @transform_1, window_bounds = array<i64: 4, 128>}, {pipeline_mode = #tpu.pipeline_mode<synchronous>, transform_indices = @transform_2, window_bounds = array<i64: 1, 128>}, {transform_indices = @transform_3, window_bounds = array<i64: 1, 1, 128>}]} {
    %c0_i32 = arith.constant 0 : i32
    %0 = arith.cmpi eq, %arg1, %c0_i32 : i32
    %1 = arith.extui %0 : i1 to i32
    %c0_i32_0 = arith.constant 0 : i32
    %2 = arith.cmpi ne, %1, %c0_i32_0 : i32
    scf.if %2 {
      %cst_9 = arith.constant 0.000000e+00 : f32
      %11 = vector.broadcast %cst_9 : f32 to vector<1x4xf32>
      %c0_10 = arith.constant 0 : index
      %c0_11 = arith.constant 0 : index
      %12 = vector.load %arg6[%c0_10, %c0_11] : memref<1x4xf32, #tpu.memory_space<vmem>>, vector<1x4xf32>
      tpu.vector_store %arg6[%c0_10, %c0_11], %11 {strides = array<i32>} : memref<1x4xf32, #tpu.memory_space<vmem>>, vector<1x4xf32>,
    } else {
    }
    %c0 = arith.constant 0 : index
    %c0_1 = arith.constant 0 : index
    %c0_2 = arith.constant 0 : index
    %3 = vector.load %arg2[%c0, %c0_1, %c0_2] : memref<1x4x256xf32, #tpu.memory_space<vmem>>, vector<1x4x256xf32>
    %c0_3 = arith.constant 0 : index
    %c0_4 = arith.constant 0 : index
    %4 = vector.load %arg6[%c0_3, %c0_4] : memref<1x4xf32, #tpu.memory_space<vmem>>, vector<1x4xf32>
    %cst = arith.constant dense<0.000000e+00> : vector<1x4xf32>
    %5 = vector.multi_reduction <add>, %3, %cst [2] : vector<1x4x256xf32> to vector<1x4xf32>
    %6 = arith.addf %4, %5 : vector<1x4xf32>
    %c0_5 = arith.constant 0 : index
    %c0_6 = arith.constant 0 : index
    %7 = vector.load %arg6[%c0_5, %c0_6] : memref<1x4xf32, #tpu.memory_space<vmem>>, vector<1x4xf32>
    tpu.vector_store %arg6[%c0_5, %c0_6], %6 {strides = array<i32>} : memref<1x4xf32, #tpu.memory_space<vmem>>, vector<1x4xf32>,
    %c0_i32_7 = arith.constant 0 : i32
    %8 = arith.cmpi eq, %arg1, %c0_i32_7 : i32
    %9 = arith.extui %8 : i1 to i32
    %c0_i32_8 = arith.constant 0 : i32
    %10 = arith.cmpi ne, %9, %c0_i32_8 : i32
    scf.if %10 {
      %c0_9 = arith.constant 0 : index
      %c0_10 = arith.constant 0 : index
      %11 = vector.load %arg6[%c0_9, %c0_10] : memref<1x4xf32, #tpu.memory_space<vmem>>, vector<1x4xf32>
      %c0_11 = arith.constant 0 : index
      %c0_12 = arith.constant 0 : index
      %12 = vector.load %arg3[%c0_11, %c0_12] : memref<4x128xf32, #tpu.memory_space<vmem>>, vector<4x128xf32>
      %cst_13 = arith.constant dense<0.000000e+00> : vector<1x128xf32>
      %13 = tpu.matmul %11, %12, %cst_13 {dimension_numbers = #tpu.dot_dimension_numbers<[1], [0], [0], [1], [0, 0, 1, 1], [], []>, precision = #tpu.contract_precision<fp32>} : vector<1x4xf32>, vector<4x128xf32>, vector<1x128xf32> -> vector<1x128xf32>
      %c0_14 = arith.constant 0 : index
      %c0_15 = arith.constant 0 : index
      %14 = vector.load %arg4[%c0_14, %c0_15] : memref<1x128xf32, #tpu.memory_space<vmem>>, vector<1x128xf32>
      %15 = arith.addf %13, %14 : vector<1x128xf32>
      %16 = arith.negf %15 : vector<1x128xf32>
      %17 = math.exp %16 : vector<1x128xf32>
      %cst_16 = arith.constant 1.000000e+00 : f32
      %18 = vector.broadcast %cst_16 : f32 to vector<1x128xf32>
      %19 = arith.addf %18, %17 : vector<1x128xf32>
      %20 = arith.divf %18, %19 : vector<1x128xf32>
      %c0_17 = arith.constant 0 : index
      %c0_18 = arith.constant 0 : index
      %c0_19 = arith.constant 0 : index
      %21 = vector.load %arg5[%c0_17, %c0_18, %c0_19] : memref<1x1x128xf32, #tpu.memory_space<vmem>>, vector<1x1x128xf32>
      %22 = vector.shape_cast %21 : vector<1x1x128xf32> to vector<1x128xf32>
      %23 = vector.shape_cast %20 : vector<1x128xf32> to vector<1x1x128xf32>
      tpu.vector_store %arg5[%c0_17, %c0_18, %c0_19], %23 {strides = array<i32>} : memref<1x1x128xf32, #tpu.memory_space<vmem>>, vector<1x1x128xf32>,
    } else {
    }
    return
  }
  func.func @transform_0(%arg0: i32, %arg1: i32) -> (i32, i32, i32) {
    %c0_i32 = arith.constant 0 : i32
    %c0_i32_0 = arith.constant 0 : i32
    return %arg0, %c0_i32, %arg1 : i32, i32, i32
  }
  func.func @transform_1(%arg0: i32, %arg1: i32) -> (i32, i32) {
    %c0_i32 = arith.constant 0 : i32
    %c0_i32_0 = arith.constant 0 : i32
    %c0_i32_1 = arith.constant 0 : i32
    return %c0_i32, %c0_i32_0 : i32, i32
  }
  func.func @transform_2(%arg0: i32, %arg1: i32) -> (i32, i32) {
    %c0_i32 = arith.constant 0 : i32
    %c0_i32_0 = arith.constant 0 : i32
    %c0_i32_1 = arith.constant 0 : i32
    return %c0_i32, %c0_i32_0 : i32, i32
  }
  func.func @transform_3(%arg0: i32, %arg1: i32) -> (i32, i32, i32) {
    %c0_i32 = arith.constant 0 : i32
    %c0_i32_0 = arith.constant 0 : i32
    %c0_i32_1 = arith.constant 0 : i32
    return %arg0, %c0_i32, %c0_i32_0 : i32, i32, i32
  }
}

</mosaic_0001>

<bundles_post_ra>
// kernel: tpu_custom_call.1
= control target key start
LH: loop header
LB: loop body
LE: loop exit
PB: predicated region body
PF: predicated region fallthrough
CT: control target
= control target key end

     0   :  { %8 = vsyncpa [#allocation4], 0  ;;  %s1367_s0 = inlined_call_operand.hbm [shape: f32[2,4,256], index: 0, kind: input, shape index: {}]   ;;  %s1368_s1 = inlined_call_operand.hbm [shape: f32[4,128], index: 1, kind: input, shape index: {}]   ;;  %s1369_s2 = inlined_call_operand.vmem [shape: f32[1,128], index: 2, kind: input, shape index: {}]   ;;  %s1370_s3 = inlined_call_operand.hbm [shape: f32[2,1,128], index: 3, kind: output, shape index: {}]  }
   0x1   :  { %10 = vsyncpa [#allocation4 + $0x1], 0 }
   0x2   :  { %11 = vsyncpa [#allocation7], 0 }
   0x3   :  { %12 = vsyncpa [#allocation5], 0 }
   0x4   :  { %14 = vsyncpa [#allocation5 + $0x1], 0  ;;  %s1175_s12 = smov 0   ;;  %s1177_s13 = smov 0  }
   0x5   :  { %s1179_s14 = smov 0   ;;  %s1181_s15 = smov 0  }
   0x6   :  { %s1183_s16 = smov 0   ;;  %s1185_s17 = smov 0  }
   0x7 LB: > { %s867_s18 = sadd.s32 4294967295, %s1146_s17   ;;  %s868_s19 = sadd.s32 4294967294, %s1146_s17   ;;  %s1146_s17 = sphi %s1185_s17, %s20_s17   ;;  %s1142_s16 = sphi %s1183_s16, %s1387_s16   ;;  %s1138_s15 = sphi %s1181_s15, %s1386_s15   ;;  %s1134_s14 = sphi %s1179_s14, %s1385_s14   ;;  %s1130_s13 = sphi %s1177_s13, %s1384_s13   ;;  %s1126_s12 = sphi %s1175_s12, %s1383_s12  }
   0x8   : > { %p54_p0 = scmp.ne.s32.totalorder %s1130_s13, %s1126_s12  ;;  %p1209_p1 = scmp.eq.s32.totalorder %s867_s18, 0 }
   0x9   : > { %p1213_p2 = scmp.eq.s32.totalorder %s867_s18, 1  ;;  %p126_p3 = scmp.eq.s32.totalorder %s868_s19, 1 }
   0xa   : > { %p1219_p4 = por %p1209_p1, %p54_p0  ;;  %p869_p5 = scmp.ge.s32.totalorder %s1146_s17, 1 }
   0xb   : > { %p1224_p6 = por %p126_p3, %p54_p0  ;;  %p133_p7 = scmp.lt.s32.totalorder %s1146_s17, 3 }
   0xc   : > { %s1374_s22 = scalar_select %p1219_p4, 1, 0 }
   0xd   : > { %s1375_s23 = scalar_select %p1224_p6, 1, 0 }
   0xe   : > { %p1229_p8 = pnand %p869_p5, %p133_p7  ;;  %s1148_s25 = smov [#allocation6]  }
   0xf   : > { %s146_s26 = sshll.u32 %s1148_s25, 4  ;;  %s32_s28 = sadd.s32 1, %s1142_s16  ;;  %s147_s26 = int_to_ptr.vmem [resolvable:$true] %s146_s26 }
  0x10   : > { %p933_p10 = pneg %p1229_p8  ;;  %s41_s29 = sadd.s32 1, %s1134_s14 }
  0x11   : > { %p34_p12 = scmp.ge.s32.totalorder %s32_s28, 2  ;;  %s1019_s30 = scalar_lea.vmem %s147_s26, 64 }
  0x12   : > { %p1238_p11 = pnand %p933_p10, %p1209_p1  ;;  %p1020_p0 = scmp.ne.s32.totalorder %s147_s26, %s1019_s30 }
  0x13   : > { %p1027_p7 = scmp.lt.s32.totalorder %s147_s26, %s147_s26  ;;  %p1028_p6 = scmp.lt.s32.totalorder %s1019_s30, %s1019_s30 }
  0x14   : > { %p1010_p13 = pneg %p1238_p11 }
  0x15   : > { %p1029_p9 = por %p1028_p6, %p1027_p7 }
  0x16   : > { %p1022_p3 = pnand %p1020_p0, %p1010_p13 }
  0x18   : > { %p1023_p5 = pneg %p1022_p3 }
  0x1a   : > { %p1030_p4 = pnand %p1029_p9, %p1023_p5 }
  0x1c   : > { %1033 = shalt.err (!%p1030_p4)
}
  0x1d   : > { %936 = dma.hbm_to_vmem [thread:$0]  (!%p1238_p11), %s1368_s1, 64, %s147_s26, [#allocation7]  }
  0x1e   : > { %s1389_s28 = smov (%p34_p12, %s32_s28), 0  ;;  %p48_p6 = scmp.ne.s32.totalorder %s1134_s14, %s1130_s13 }
  0x1f   : > { %p49_p4 = scmp.eq.s32.totalorder %s1146_s17, 0  ;;  %s36_s6 = ssub.s32 %s1142_s16, %s1389_s28 }
  0x20   : > { %p946_p9 = scmp.lt.s32.totalorder %s1146_s17, 2  ;;  %p39_p10 = scmp.eq.s32.totalorder %s36_s6, 0 }
  0x21   : > { %p50_p13 = por %p49_p4, %p48_p6  ;;  %p1261_p0 = por %p1213_p2, %p48_p6 }
  0x22   : > { %s160_s8 = sand.u32 1, %s1134_s14   ;;  %s882_s11 = sshll.u32 %s1142_s16, 7 }
  0x23   : > { %s1267_s9 = scalar_select %p39_p10, %s1134_s14, %s41_s29  }
  0x24   : > { %s872_s10 = sshll.u32 %s160_s8, 3  ;;  %s172_s25 = scalar_lea.hbm %s1367_s0, %s882_s11 }
  0x25   : > { %s164_s26 = scalar_lea.vmem [#allocation3], %s872_s10  ;;  %p1273_p11 = pnand %p946_p9, %p50_p13 }
  0x26   : > { %s174_s27 = sshll.u32 %s164_s26, 4  ;;  %s161_s21 = scalar_lea.sflag [#allocation4], %s160_s8  ;;  %s175_s27 = int_to_ptr.vmem [resolvable:$true] %s174_s27 }
  0x27   : > { %p1036_p2 = pneg %p1273_p11  ;;  %s1047_s4 = scalar_lea.vmem %s175_s27, 128 }
  0x28   : > { %p1048_p12 = scmp.ne.s32.totalorder %s175_s27, %s1047_s4  ;;  %s1149_s29 = smov [#allocation3]  }
  0x29   : > { %s1052_s5 = sshll.u32 %s1149_s29, 4  ;;  %s1053_s5 = int_to_ptr.vmem [resolvable:$false] %s1052_s5 }
  0x2a   : > { %p1050_p3 = pnand %p1048_p12, %p1036_p2  ;;  %s1054_s6 = scalar_lea.vmem %s1053_s5, 256 }
  0x2b   : > { %p1055_p7 = scmp.lt.s32.totalorder %s175_s27, %s1053_s5  ;;  %p1056_p6 = scmp.lt.s32.totalorder %s1054_s6, %s1047_s4 }
  0x2c   : > { %p1051_p5 = pneg %p1050_p3 }
  0x2d   : > { %p1057_p4 = por %p1056_p6, %p1055_p7 }
  0x2f   : > { %p1058_p10 = pnand %p1057_p4, %p1051_p5 }
  0x31   : > { %1061 = shalt.err (!%p1058_p10)
}
  0x32   : > { %940 = dma.hbm_to_vmem [thread:$0]  (!%p1273_p11), %s172_s25, 128, %s175_s27, %s161_s21  }
  0x33   : > { %183 = sbr.rel (%p1229_p8) target bundleno = 614 (0x266), region = 32  ;;  %s1284_s8 = sand.u32 (!%p1229_p8), 1, %s1130_s13  }
  0x34   : > { %s876_s10 = sshll.u32 (!%p1229_p8), %s1284_s8, 3  ;;  %s186_s11 = scalar_lea.sflag (!%p1229_p8), [#allocation4], %s1284_s8 }
  0x35   : > { %s189_s18 = scalar_lea.vmem (!%p1229_p8), [#allocation3], %s876_s10  ;;  %p1380_p9 = scmp.ne.s32.totalorder (!%p1229_p8), %s1374_s22, 0 }
  0x38   : > { %1113 = dma.done.wait (%p1380_p9), %s186_s11, 128  }
  0x39   : > { %1115 = vsyncadd (%p1380_p9), %s186_s11, 4294967168 }
  0x3a   : > { %1117 = dma.done.wait (%p1209_p1), [#allocation7], 64  }
  0x3b   : > { %1119 = vsyncadd (%p1209_p1), [#allocation7], 4294967232  ;;  %vm220_vm0 = vcmask 24576   ;;  %v1150_v0 = vmov 0.0   ;;  %vm227_vm1 = vcmask 1043456   ;;  %v222_v1 = vld [vmem:[%s189_s18] sm:$0xff]  ;;  %v234_v10 = vlaneseq }
  0x3c   : > { %221 = vst.msk [vmem:[#allocation2] sm:$0x1] %vm220_vm0, %v1150_v0  ;;  %900 = vmatprep.subr.mxu1 %v1150_v0  ;;  %895 = vmatprep.subr.mxu0 %v1150_v0  ;;  %v305_v2 = vld [vmem:[#allocation6] sm:$0xf]  ;;  %v225_v3 = vcombine.high %v222_v1, %v222_v1  ;;  %v228_v4 = vsel %vm227_vm1, %v222_v1, 0.0  ;;  %v1151_v9 = vmov 0  }
  0x3d   : > { %v312_v5 = vsel %vm227_vm1, %v305_v2, 0  ;;  %1002 = vset.pattern.permute.xlu0 %v1151_v9  ;;  %v235_v11 = vshrl.u32 %v234_v10, 7  ;;  %v278_v12 = vand.u32 127, %v234_v10  ;;  %v1152_v14 = vmov 1966171168   ;;  %s879_s24 = sshll.u32 %s1138_s15, 4 }
  0x3e   : > { %v345_v6 = vand.u32 4294901760, %v312_v5  ;;  %v229_v7 = vsel %vm227_vm1, %v225_v3, 0.0  ;;  %v253_v15 = vunpack.c.l.s4 %v1152_v14  ;;  %vm1153_vm2 = vmmov 0   ;;  %v306_v54 = vld [vmem:[%s1369_s2] sm:$0x1]  ;;  %s214_s19 = scalar_lea.vmem [#allocation8], %s1284_s8  ;;  %s1325_s30 = scalar_lea.hbm %s1370_s3, %s879_s24 }
  0x3f   : > { %v230_v8 = vadd.f32 %v229_v7, %v228_v4  ;;  %v281_v13 = vsub.s32 %v278_v12, %v235_v11  ;;  %v236_v17 = vsub.s32 0, %v235_v11  ;;  %v240_v18 = vsub.s32 1, %v235_v11  ;;  %902 = vmatprep.mubr.msk.f32.mxu1 %vm1153_vm2, %v1150_v0  ;;  %897 = vmatprep.mubr.msk.f32.mxu0 %vm1153_vm2, %v1150_v0  ;;  %s780_s25 = sshll.u32 %s214_s19, 4  ;;  %s768_s21 = scalar_lea.sflag [#allocation5], %s1284_s8  ;;  %s781_s25 = int_to_ptr.vmem [resolvable:$true] %s780_s25 }
  0x40   : > { %896 = vmatpush3.msra.mxu0 %v345_v6  ;;  %v254_v16 = vunpack.c.0.s8 %v253_v15  ;;  %v244_v19 = vsub.s32 2, %v235_v11  ;;  %v248_v20 = vsub.s32 3, %v235_v11  ;;  %v422_v33 = vsub.f32 %v312_v5, %v345_v6  ;;  %s1062_s4 = scalar_lea.vmem %s781_s25, 16  ;;  %s1154_s29 = smov [#allocation8]  }
  0x41   : > { %905 = vmatprep.subr.mxu0 %v1150_v0  ;;  %231 = vadd.xlane.f32.xlu0 %v230_v8  ;;  %vm307_vm3 = vcmask 31744   ;;  %p1063_p1 = scmp.ne.s32.totalorder %s781_s25, %s1062_s4  ;;  %s1066_s5 = sshll.u32 %s1154_s29, 4  ;;  %s1067_s5 = int_to_ptr.vmem [resolvable:$false] %s1066_s5 }
  0x42   : > { %v257_v22 = vsub.s32 %v254_v16, %v235_v11  ;;  %v423_v34 = vand.u32 4294901760, %v422_v33  ;;  %s1068_s15 = scalar_lea.vmem %s1067_s5, 32  ;;  %p1069_p11 = scmp.lt.s32.totalorder %s781_s25, %s1067_s5 }
  0x43   : > { %v223_v40 = vld [vmem:[#allocation2] sm:$0x1]  ;;  %p1064_p8 = pnand %p1063_p1, %p1261_p0  ;;  %p1070_p2 = scmp.lt.s32.totalorder %s1068_s15, %s1062_s4 }
  0x44   : > { %v424_v35 = vsub.f32 %v422_v33, %v423_v34 }
  0x45   : > { %p1065_p13 = pneg %p1064_p8  ;;  %p1071_p12 = por %p1070_p2, %p1069_p11 }
  0x46   : > { %v425_v36 = vand.u32 4294901760, %v424_v35 }
  0x47   : > { %p1072_p3 = pnand %p1071_p12, %p1065_p13 }
  0x48   : > { %901 = vmatpush3.msra.mxu1 %v425_v36 }
  0x49   : > { %910 = vmatprep.subr.mxu1 %v1150_v0 }
  0xca   : > { %v232_v21 = vpop.xlane.xlu0 %231 }
  0xcb   : > { %v237_v23 = vrot.slane %v232_v21, %v236_v17  ;;  %v241_v24 = vrot.slane %v232_v21, %v240_v18  ;;  %v245_v25 = vrot.slane %v232_v21, %v244_v19  ;;  %v249_v26 = vrot.slane %v232_v21, %v248_v20 }
  0xcd   : > { %v250_v27 = vcombine.low %v237_v23, %v241_v24  ;;  %v251_v28 = vcombine.low %v245_v25, %v249_v26 }
  0xcf   : > { %v258_v29 = vrot.slane %v250_v27, %v257_v22  ;;  %v265_v30 = vrot.slane %v251_v28, %v257_v22 }
  0xd1   : > { %v266_v31 = vcombine.low %v258_v29, %v265_v30 }
  0xd3   : > { %v273_v32 = vrot.slane %v266_v31, %v257_v22 }
  0xd5   : > { %275 = vperm.xlu0 %1002, %v273_v32  }
 0x150   : > { %v276_v37 = vpop.permute.xlu0 %275 }
 0x151   : > { %v282_v38 = vrot.slane %v276_v37, %v281_v13 }
 0x153   : > { %v289_v39 = vrot.slane %v282_v38, %v257_v22 }
 0x155   : > { %v296_v41 = vrot.slane %v289_v39, %v257_v22 }
 0x157   : > { %v298_v42 = vadd.f32 %v296_v41, %v223_v40 }
 0x159   : > { %300 = vst.msk [vmem:[#allocation2] sm:$0x1] %vm220_vm0, %v298_v42 }
 0x160   : > { %v304_v43 = vld [vmem:[#allocation2] sm:$0x1] }
 0x161   : > { %v309_v44 = vsel %vm307_vm3, %v304_v43, 0 }
 0x162   : > { %v380_v45 = vand.u32 4294901760, %v309_v44 }
 0x164   : > { %v381_v46 = vsub.f32 %v309_v44, %v380_v45  ;;  %903 = vmatmul.mubr.f32.vlgmr.msra.gmra.mxu1 %v380_v45 }
 0x165   : > { %911 = vmatpush3.msra.mxu1 %v345_v6  ;;  %912 = vmatprep.mubr.msk.f32.mxu1 %vm1153_vm2, %v1150_v0 }
 0x166   : > { %v382_v47 = vand.u32 4294901760, %v381_v46  ;;  %920 = vmatprep.subr.mxu1 %v1150_v0 }
 0x168   : > { %913 = vmatmul.mubr.f32.vlgmr.msra.gmra.mxu1 %v382_v47  ;;  %v383_v48 = vsub.f32 %v381_v46, %v382_v47 }
 0x169   : > { %921 = vmatpush3.msra.mxu1 %v345_v6  ;;  %922 = vmatprep.mubr.msk.f32.mxu1 %vm1153_vm2, %v1150_v0 }
 0x16a   : > { %v384_v49 = vand.u32 4294901760, %v383_v48 }
 0x16c   : > { %898 = vmatmul.mubr.f32.vlgmr.msra.gmra.mxu0 %v384_v49  ;;  %923 = vmatmul.mubr.f32.vlgmr.msra.gmra.mxu1 %v380_v45 }
 0x16d   : > { %906 = vmatpush3.msra.mxu0 %v422_v33  ;;  %907 = vmatprep.mubr.msk.f32.mxu0 %vm1153_vm2, %v1150_v0 }
 0x16e   : > { %915 = vmatprep.subr.mxu0 %v1150_v0 }
 0x170   : > { %908 = vmatmul.mubr.f32.vlgmr.msra.gmra.mxu0 %v381_v46 }
 0x171   : > { %916 = vmatpush3.msra.mxu0 %v423_v34  ;;  %917 = vmatprep.mubr.msk.f32.mxu0 %vm1153_vm2, %v1150_v0 }
 0x174   : > { %918 = vmatmul.mubr.f32.vlgmr.msra.gmra.mxu0 %v380_v45 }
 0x224   : > { %v462_v50 = vpop.f32.mrf.mxu1 }
 0x226   : > { %v904_v51 = vpop.f32.mrf.mxu1 }
 0x228   : > { %v610_v52 = vpop.f32.mrf.mxu1 }
 0x22a   : > { %v914_v53 = vpop.f32.mrf.mxu1 }
 0x22c   : > { %v386_v55 = vpop.f32.mrf.mxu0  ;;  %v756_v56 = vpop.f32.mrf.mxu1 }
 0x22d   : > { %v387_v57 = vadd.f32 %v386_v55, %v306_v54 }
 0x22e   : > { %v899_v58 = vpop.f32.mrf.mxu0  ;;  %v924_v59 = vpop.f32.mrf.mxu1 }
 0x22f   : > { %v463_v60 = vadd.f32 %v462_v50, %v387_v57 }
 0x230   : > { %v536_v61 = vpop.f32.mrf.mxu0 }
 0x231   : > { %v537_v62 = vadd.f32 %v536_v61, %v463_v60 }
 0x232   : > { %v909_v63 = vpop.f32.mrf.mxu0 }
 0x233   : > { %v611_v0 = vadd.f32 %v610_v52, %v537_v62 }
 0x234   : > { %v684_v1 = vpop.f32.mrf.mxu0 }
 0x235   : > { %v685_v2 = vadd.f32 %v684_v1, %v611_v0 }
 0x236   : > { %v919_v3 = vpop.f32.mrf.mxu0 }
 0x237   : > { %v757_v4 = vadd.f32 %v756_v56, %v685_v2 }
 0x239   : > { %v878_v5 = vmul.f32 -1.442695, %v757_v4 }
 0x23b   : > { %1004 = vpow2.f32 %v878_v5 }
 0x248   : > { %v1005_v6 = vpop.eup %1004 }
 0x249   : > { %v763_v7 = vadd.f32 1.0, %v1005_v6 }
 0x24b   : > { %1006 = vrcp.f32 %v763_v7 }
 0x258   : > { %v1007_v8 = vpop.eup %1006 }
 0x259   : > { %766 = vst [vmem:[%s214_s19] sm:$0x1] %v1007_v8 }
 0x25a   : > { %1075 = shalt.err (!%p1072_p3)
}
 0x25b   : > { %s1076_s6 = scalar_lea.hbm %s1325_s30, 16  ;;  %s1080_s11 = scalar_lea.hbm %s1370_s3, 32 }
 0x25c   : > { %p1077_p5 = scmp.ne.s32.totalorder %s1325_s30, %s1076_s6  ;;  %p1081_p4 = scmp.lt.s32.totalorder %s1325_s30, %s1370_s3 }
 0x25d   : > { %p1082_p10 = scmp.lt.s32.totalorder %s1080_s11, %s1076_s6 }
 0x25e   : > { %p1078_p7 = pnand %p1077_p5, %p1261_p0 }
 0x25f   : > { %p1083_p9 = por %p1082_p10, %p1081_p4 }
 0x260   : > { %p1079_p6 = pneg %p1078_p7 }
 0x262   : > { %p1084_p1 = pnand %p1083_p9, %p1079_p6 }
 0x264   : > { %1087 = shalt.err (!%p1084_p1)
}
 0x265   : > { %931 = dma.vmem_to_hbm [thread:$0]  (%p1261_p0), %s781_s25, 16, %s1325_s30, %s768_s21  }
 0x266 PF: > { %s792_s22 = sand.u32 1, %s1126_s12   ;;  %p1381_p8 = scmp.ne.s32.totalorder %s1375_s23, 0 }
 0x267   : > { %p1382_p13 = scmp.ge.s32.totalorder %s1146_s17, 2  ;;  %s793_s24 = scalar_lea.sflag [#allocation5], %s792_s22 }
 0x269   : > { %p942_p11 = pnand %p1382_p13, %p1381_p8 }
 0x26b   : > { %p943_p2 = pneg %p942_p11 }
 0x26d   : > { %1121 = dma.done.wait (%p943_p2), %s793_s24, 16  }
 0x26e   : > { %1123 = vsyncadd (%p943_p2), %s793_s24, 4294967280  ;;  %s20_s17 = sadd.s32 1, %s1146_s17   ;;  %s1383_s12 = smov %s1130_s13 }
 0x26f   : > { %p17_p12 = scmp.ge.s32.totalorder %s20_s17, 4   ;;  %s1384_s13 = smov %s1134_s14 }
 0x270   : > { %s1385_s14 = smov %s1267_s9  ;;  %s1386_s15 = smov %s1142_s16 }
 0x271   : > { %s1387_s16 = smov %s1389_s28  ;;  %19 = sbr.rel (!%p17_p12) target bundleno = 7 (0x7), region = 89 }
 0x276   :  { %797 = vsyncpa [#allocation4], 1 }
 0x277   :  { %799 = vsyncpa [#allocation4 + $0x1], 1 }
 0x278   :  { %800 = vsyncpa [#allocation7], 1 }
 0x279   :  { %801 = vsyncpa [#allocation5], 1 }
 0x27a   :  { %803 = vsyncpa [#allocation5 + $0x1], 1 }

</bundles_post_ra>
